<compile_context>
chip_gen: v5e
topology: v5e:2x2
jax: 0.10.0
libtpu: 0.0.40
codegen_flags: <defaults>
</compile_context>

<pallas_src>
import functools

import jax
import jax.numpy as jnp
from jax.experimental import pallas as pl
from jax.experimental.pallas import tpu as pltpu


def _label_smoothing_kernel(pred_ref, tgt_ref, out_ref, *,
                            num_classes, smoothing, total_rows, tile_n):
    i = pl.program_id(0)

    x = pred_ref[...].astype(jnp.float32)                     # (tn, C) f32
    tgt = tgt_ref[...]                                         # (tn, 1) int32

    confidence = jnp.float32(1.0 - smoothing)
    off = jnp.float32(smoothing / (num_classes - 1))

    # Streamed log-softmax statistics; logp is never materialized.
    m = jnp.max(x, axis=-1, keepdims=True)                     # (tn, 1)
    z = x - m                                                  # (tn, C)
    sumexp = jnp.sum(jnp.exp(z), axis=-1, keepdims=True)       # (tn, 1)
    lse = jnp.log(sumexp)                                      # (tn, 1)
    sum_z = jnp.sum(z, axis=-1, keepdims=True)                 # (tn, 1)

    # Target logit via a broadcast compare against a (1, C) iota.
    # NOTE: targets outside [0, C) silently contribute 0 (PyTorch would raise).
    col = jax.lax.broadcasted_iota(jnp.int32, (1, num_classes), 1)       # (1, C)
    z_tgt = jnp.sum(jnp.where(col == tgt, z, 0.0),
                    axis=-1, keepdims=True)                              # (tn, 1)

    #   -sum(true_dist * logp) = -off*sum(logp) - (conf - off)*logp[target]
    #   sum(logp)  = sum_z - C*lse ;  logp[target] = z_tgt - lse
    row_loss = (-off) * (sum_z - jnp.float32(num_classes) * lse) \
               - (confidence - off) * (z_tgt - lse)                      # (tn, 1)

    # Mask rows past N BEFORE the cross-row reduction: padded rows may be
    # inf/NaN garbage and must not poison the tile partial sum.
    row = jax.lax.broadcasted_iota(jnp.int32, row_loss.shape, 0) + i * tile_n
    row_loss = jnp.where(row < total_rows, row_loss, 0.0)

    partial = jnp.sum(row_loss)                                # scalar f32

    # Lane-dense (1, 8, 128) output block: partial at [0,0,0], zeros elsewhere,
    # so the wrapper can sum the whole output array exactly.
    r = jax.lax.broadcasted_iota(jnp.int32, (1, 8, 128), 1)
    c = jax.lax.broadcasted_iota(jnp.int32, (1, 8, 128), 2)
    out_ref[...] = jnp.where((r == 0) & (c == 0), partial, jnp.float32(0.0))


def _vmem_plan():
    """Generation-aware (working-set budget, vmem limit) in bytes."""
    try:
        cap = int(getattr(pltpu.get_tpu_info(), "vmem_capacity_bytes",
                          64 * 1024 * 1024))
    except Exception:
        cap = 64 * 1024 * 1024
    if cap >= 128 * 1024 * 1024:           # v5e / v6e: 128 MiB VMEM
        return 48 * 1024 * 1024, 80 * 1024 * 1024
    return 24 * 1024 * 1024, 40 * 1024 * 1024   # v7x: 64 MiB physical VMEM


def _choose_tile_rows(n_rows, n_classes, itemsize, working_budget_bytes,
                      max_rows=8192):
    """Largest row tile whose *working set* fits the budget.

    Working set per row ~= double-buffered input block (2 * itemsize bytes/elem)
    plus ~4 full-width f32 temporaries (cast, z, exp, select) inside the kernel.
    """
    pack = {4: 8, 2: 16, 1: 32}.get(int(itemsize), 8)   # sublane packing
    per_row = max(1, n_classes * (2 * int(itemsize) + 4 * 4))
    rows = working_budget_bytes // per_row
    rows = max(pack, min(rows, max_rows))
    if rows >= n_rows:
        return n_rows                         # single full-height tile (legal)
    return max(pack, (rows // pack) * pack)   # multiple of sublane pack


def label_smoothing_loss(pred, target, *, smoothing=0.0, tile_n=None,
                         vmem_limit_bytes=None):
    """pred: (N, C) float (f32 or bf16); target: (N,) int class indices.

    Returns the scalar f32 smoothed cross-entropy (mean over rows).
    """
    N, C = pred.shape
    itemsize = jnp.dtype(pred.dtype).itemsize

    working_budget, auto_limit = _vmem_plan()
    if vmem_limit_bytes is None:
        vmem_limit_bytes = auto_limit
    if tile_n is None:
        tile_n = _choose_tile_rows(N, C, itemsize, working_budget)
    tile_n = min(tile_n, N)

    num_tiles = (N + tile_n - 1) // tile_n
    target2d = target.astype(jnp.int32).reshape(N, 1)

    kernel = functools.partial(
        _label_smoothing_kernel,
        num_classes=C,
        smoothing=float(smoothing),
        total_rows=N,
        tile_n=tile_n,
    )

    cost = pl.CostEstimate(
        flops=int(5 * N * C),
        transcendentals=int(N * C),
        bytes_accessed=int(N * C * itemsize + N * 4 + num_tiles * 8 * 128 * 4),
    )

    partials = pl.pallas_call(
        kernel,
        out_shape=jax.ShapeDtypeStruct((num_tiles, 8, 128), jnp.float32),
        grid_spec=pltpu.PrefetchScalarGridSpec(
            num_scalar_prefetch=0,
            grid=(num_tiles,),
            in_specs=[
                pl.BlockSpec((tile_n, C), lambda i: (i, 0)),
                pl.BlockSpec((tile_n, 1), lambda i: (i, 0)),
            ],
            out_specs=pl.BlockSpec((1, 8, 128), lambda i: (i, 0, 0)),
        ),
        compiler_params=pltpu.CompilerParams(
            dimension_semantics=("parallel",),   # independent row tiles
            vmem_limit_bytes=int(vmem_limit_bytes),
        ),
        cost_estimate=cost,
    )(pred, target2d)

    # Every tile wrote its partial at [0, 0] and zeros elsewhere -> exact sum.
    return jnp.sum(partials) / jnp.float32(N)


def _reference(pred, target, smoothing):
    """Plain-JAX reference, same math as the PyTorch module."""
    N, C = pred.shape
    logp = jax.nn.log_softmax(pred.astype(jnp.float32), axis=-1)
    true_dist = jnp.full((N, C), smoothing / (C - 1), dtype=jnp.float32)
    true_dist = true_dist.at[jnp.arange(N), target].set(1.0 - smoothing)
    return jnp.mean(jnp.sum(-true_dist * logp, axis=-1))


if __name__ == "__main__":
    key = jax.random.PRNGKey(0)
    k_pred, k_tgt = jax.random.split(key)

    # Small shapes consistent with the module: batch of 16 examples, 32 classes.
    N, C = 16, 32
    smoothing = 0.1

    pred = jax.random.normal(k_pred, (N, C), dtype=jnp.float32)
    target = jax.random.randint(k_tgt, (N,), 0, C, dtype=jnp.int32)

    loss = label_smoothing_loss(pred, target, smoothing=smoothing)
    jax.block_until_ready(loss)
    ref = _reference(pred, target, smoothing)
    assert jnp.allclose(loss, ref, rtol=1e-5, atol=1e-5), (loss, ref)

    # Ragged, multi-tile configuration to exercise masking + tiling.
    N2 = 37
    pred2 = jax.random.normal(k_pred, (N2, C), dtype=jnp.float32)
    target2 = jax.random.randint(k_tgt, (N2,), 0, C, dtype=jnp.int32)
    loss2 = label_smoothing_loss(pred2, target2, smoothing=smoothing, tile_n=8)
    jax.block_until_ready(loss2)
    ref2 = _reference(pred2, target2, smoothing)
    assert jnp.allclose(loss2, ref2, rtol=1e-5, atol=1e-5), (loss2, ref2)

    # bf16 logits (halved HBM traffic path); kernel casts to f32 internally.
    pred3 = pred.astype(jnp.bfloat16)
    loss3 = label_smoothing_loss(pred3, target, smoothing=smoothing)
    jax.block_until_ready(loss3)
    ref3 = _reference(pred3.astype(jnp.float32), target, smoothing)
    assert jnp.allclose(loss3, ref3, rtol=1e-5, atol=1e-5), (loss3, ref3)

    print("KERNEL_OK")
</pallas_src>

<mosaic_0001>
module attributes {stable_mosaic.version = 11 : i64} {
  func.func @_label_smoothing_kernel(%arg0: i32, %arg1: memref<16x32xf32, #tpu.memory_space<vmem>>, %arg2: memref<16x1xi32, #tpu.memory_space<vmem>>, %arg3: memref<1x8x128xf32, #tpu.memory_space<vmem>>) attributes {dimension_semantics = [#tpu.dimension_semantics<parallel>], iteration_bounds = array<i64: 1>, scalar_prefetch = 0 : i64, scratch_operands = 0 : i64, tpu.core_type = #tpu.core_type<tc>, window_params = [{transform_indices = @transform_0, window_bounds = array<i64: 16, 32>}, {transform_indices = @transform_1, window_bounds = array<i64: 16, 1>}, {transform_indices = @transform_2, window_bounds = array<i64: 1, 8, 128>}]} {
    %c0 = arith.constant 0 : index
    %c0_0 = arith.constant 0 : index
    %0 = vector.load %arg1[%c0, %c0_0] : memref<16x32xf32, #tpu.memory_space<vmem>>, vector<16x32xf32>
    %c0_1 = arith.constant 0 : index
    %c0_2 = arith.constant 0 : index
    %1 = vector.load %arg2[%c0_1, %c0_2] : memref<16x1xi32, #tpu.memory_space<vmem>>, vector<16x1xi32>
    %cst = arith.constant dense<0xFF800000> : vector<16xf32>
    %2 = vector.multi_reduction <maximumf>, %0, %cst [1] : vector<16x32xf32> to vector<16xf32>
    %3 = vector.shape_cast %2 : vector<16xf32> to vector<16x1xf32>
    %4 = vector.broadcast %3 : vector<16x1xf32> to vector<16x32xf32>
    %5 = arith.subf %0, %4 : vector<16x32xf32>
    %6 = math.exp %5 : vector<16x32xf32>
    %cst_3 = arith.constant dense<0.000000e+00> : vector<16xf32>
    %7 = vector.multi_reduction <add>, %6, %cst_3 [1] : vector<16x32xf32> to vector<16xf32>
    %8 = vector.shape_cast %7 : vector<16xf32> to vector<16x1xf32>
    %9 = math.log %8 : vector<16x1xf32>
    %cst_4 = arith.constant dense<0.000000e+00> : vector<16xf32>
    %10 = vector.multi_reduction <add>, %5, %cst_4 [1] : vector<16x32xf32> to vector<16xf32>
    %11 = vector.shape_cast %10 : vector<16xf32> to vector<16x1xf32>
    %12 = tpu.iota {dimensions = array<i32: 1>} : vector<1x32xi32>
    %13 = vector.broadcast %12 : vector<1x32xi32> to vector<16x32xi32>
    %14 = vector.broadcast %1 : vector<16x1xi32> to vector<16x32xi32>
    %15 = arith.cmpi eq, %13, %14 : vector<16x32xi32>
    %cst_5 = arith.constant 0.000000e+00 : f32
    %16 = vector.broadcast %cst_5 : f32 to vector<16x32xf32>
    %17 = arith.select %15, %5, %16 : vector<16x32xi1>, vector<16x32xf32>
    %cst_6 = arith.constant dense<0.000000e+00> : vector<16xf32>
    %18 = vector.multi_reduction <add>, %17, %cst_6 [1] : vector<16x32xf32> to vector<16xf32>
    %19 = vector.shape_cast %18 : vector<16xf32> to vector<16x1xf32>
    %cst_7 = arith.constant 0.000000e+00 : f32
    %cst_8 = arith.constant 0.0032258064 : f32
    %20 = arith.subf %cst_7, %cst_8 : f32
    %cst_9 = arith.constant 3.200000e+01 : f32
    %21 = vector.broadcast %cst_9 : f32 to vector<16x1xf32>
    %22 = arith.mulf %21, %9 : vector<16x1xf32>
    %23 = arith.subf %11, %22 : vector<16x1xf32>
    %24 = vector.broadcast %20 : f32 to vector<16x1xf32>
    %25 = arith.mulf %24, %23 : vector<16x1xf32>
    %cst_10 = arith.constant 0.899999976 : f32
    %cst_11 = arith.constant 0.0032258064 : f32
    %26 = arith.subf %cst_10, %cst_11 : f32
    %27 = arith.subf %19, %9 : vector<16x1xf32>
    %28 = vector.broadcast %26 : f32 to vector<16x1xf32>
    %29 = arith.mulf %28, %27 : vector<16x1xf32>
    %30 = arith.subf %25, %29 : vector<16x1xf32>
    %31 = tpu.iota {dimensions = array<i32: 0>} : vector<16x1xi32>
    %c16_i32 = arith.constant 16 : i32
    %32 = arith.muli %arg0, %c16_i32 : i32
    %33 = vector.broadcast %32 : i32 to vector<16x1xi32>
    %34 = arith.addi %31, %33 : vector<16x1xi32>
    %c16_i32_12 = arith.constant 16 : i32
    %35 = vector.broadcast %c16_i32_12 : i32 to vector<16x1xi32>
    %36 = arith.cmpi slt, %34, %35 : vector<16x1xi32>
    %cst_13 = arith.constant 0.000000e+00 : f32
    %37 = vector.broadcast %cst_13 : f32 to vector<16x1xf32>
    %38 = arith.select %36, %30, %37 : vector<16x1xi1>, vector<16x1xf32>
    %39 = vector.shape_cast %38 : vector<16x1xf32> to vector<1x16x1xf32>
    %cst_14 = arith.constant dense<0.000000e+00> : vector<1xf32>
    %40 = vector.multi_reduction <add>, %39, %cst_14 [1, 2] : vector<1x16x1xf32> to vector<1xf32>
    %41 = vector.shape_cast %40 : vector<1xf32> to vector<1x1x1xf32>
    %42 = vector.extract %41[0, 0, 0] : f32 from vector<1x1x1xf32>
    %43 = tpu.iota {dimensions = array<i32: 1>} : vector<1x8x128xi32>
    %44 = tpu.iota {dimensions = array<i32: 2>} : vector<1x8x128xi32>
    %c0_i32 = arith.constant 0 : i32
    %45 = vector.broadcast %c0_i32 : i32 to vector<1x8x128xi32>
    %46 = arith.cmpi eq, %43, %45 : vector<1x8x128xi32>
    %c0_i32_15 = arith.constant 0 : i32
    %47 = vector.broadcast %c0_i32_15 : i32 to vector<1x8x128xi32>
    %48 = arith.cmpi eq, %44, %47 : vector<1x8x128xi32>
    %49 = arith.andi %46, %48 : vector<1x8x128xi1>
    %cst_16 = arith.constant 0.000000e+00 : f32
    %50 = vector.broadcast %42 : f32 to vector<1x8x128xf32>
    %51 = vector.broadcast %cst_16 : f32 to vector<1x8x128xf32>
    %52 = arith.select %49, %50, %51 : vector<1x8x128xi1>, vector<1x8x128xf32>
    %c0_17 = arith.constant 0 : index
    %c0_18 = arith.constant 0 : index
    %c0_19 = arith.constant 0 : index
    %53 = vector.load %arg3[%c0_17, %c0_18, %c0_19] : memref<1x8x128xf32, #tpu.memory_space<vmem>>, vector<1x8x128xf32>
    tpu.vector_store %arg3[%c0_17, %c0_18, %c0_19], %52 {strides = array<i32>} : memref<1x8x128xf32, #tpu.memory_space<vmem>>, vector<1x8x128xf32>,
    return
  }
  func.func @transform_0(%arg0: i32) -> (i32, i32) {
    %c0_i32 = arith.constant 0 : i32
    %c0_i32_0 = arith.constant 0 : i32
    return %arg0, %c0_i32 : i32, i32
  }
  func.func @transform_1(%arg0: i32) -> (i32, i32) {
    %c0_i32 = arith.constant 0 : i32
    %c0_i32_0 = arith.constant 0 : i32
    return %arg0, %c0_i32 : i32, i32
  }
  func.func @transform_2(%arg0: i32) -> (i32, i32, i32) {
    %c0_i32 = arith.constant 0 : i32
    %c0_i32_0 = arith.constant 0 : i32
    %c0_i32_1 = arith.constant 0 : i32
    return %arg0, %c0_i32, %c0_i32_0 : i32, i32, i32
  }
}

</mosaic_0001>

<bundles_post_ra>
// kernel: tpu_custom_call.1
= control target key start
LH: loop header
LB: loop body
LE: loop exit
PB: predicated region body
PF: predicated region fallthrough
CT: control target
= control target key end

     0   :  { %vm16_vm0 = vcmask 261120   ;;  %v161_v3 = vmov 0   ;;  %s208_s0 = inlined_call_operand.vmem [shape: f32[16,32], index: 0, kind: input, shape index: {}]   ;;  %s209_s1 = inlined_call_operand.vmem [shape: s32[16,1], index: 1, kind: input, shape index: {}]   ;;  %s210_s2 = inlined_call_operand.hbm [shape: f32[1,8,128], index: 2, kind: output, shape index: {}]  }
   0x1   :  { %v12_v0 = vld [vmem:[%s208_s0] sm:$0xff]  ;;  %125 = vset.pattern.permute.xlu1 %v161_v3  ;;  %126 = vset.pattern.permute.xlu0 %v161_v3 }
   0x2   :  { %v14_v1 = vld [vmem:[%s209_s1] sm:$0xff]  ;;  %v17_v2 = vsel %vm16_vm0, %v12_v0, -inf }
   0x3   :  { %7 = vsyncpa [#allocation3], 0  ;;  %18 = vmax.xlane.f32.xlu0 %v17_v2  ;;  %48 = vperm.xlu1 %125, %v14_v1   ;;  %v13_v4 = vld [vmem:[%s208_s0 + $0x8] sm:$0xff]  ;;  %v45_v10 = vlaneseq  ;;  %vm86_vm3 = vcmask 7168   ;;  %s162_s0 = smov [#allocation2]   ;;  %s112_s19 = sshll.u32 %s210_s2, 4  ;;  %s113_s19 = int_to_ptr.hbm [resolvable:$true] %s112_s19 }
   0x4   :  { %v20_v5 = vsel %vm16_vm0, %v13_v4, -inf  ;;  %v15_v6 = vld [vmem:[%s209_s1 + $0x8] sm:$0xff]  ;;  %s110_s1 = sshll.u32 %s162_s0, 4  ;;  %s111_s1 = int_to_ptr.vmem [resolvable:$true] %s110_s1 }
   0x5   :  { %v194_v13 = vand.u32 127, %v45_v10  ;;  %v76_v59 = vshrl.u32 %v45_v10, 7 }
   0x7   :  { %vm99_vm4 = vcmp.eq.s32.totalorder %v76_v59, 0  ;;  %vm100_vm5 = vcmp.eq.s32.totalorder %v194_v13, 0 }
   0x8   :  { %vm101_vm6 = vmand %vm99_vm4, %vm100_vm5 }
   0xb   :  { %21 = vmax.xlane.f32.xlu0 %v20_v5  ;;  %51 = vperm.xlu1 %125, %v15_v6  }
  0x75   :  { %v49_v7 = vpop.permute.xlu1 %48 }
  0x76   :  { %v19_v8 = vpop.xlane.xlu0 %18  ;;  %vm53_vm2 = vcmp.eq.s32.totalorder %v194_v13, %v49_v7 }
  0x77   :  { %v23_v9 = vsub.f32 %v12_v0, %v19_v8 }
  0x79   :  { %v25_v11 = vmul.f32 1.442695, %v23_v9  ;;  %v39_v12 = vsel %vm16_vm0, %v23_v9, 0.0  ;;  %v55_v25 = vsel %vm53_vm2, %v23_v9, 0.0 }
  0x7a   :  { %40 = vadd.xlane.f32.xlu0 %v39_v12  ;;  %v57_v26 = vsel %vm16_vm0, %v55_v25, 0.0 }
  0x7b   :  { %127 = vpow2.f32 %v25_v11 }
  0x7d   :  { %v52_v14 = vpop.permute.xlu1 %51 }
  0x7e   :  { %v22_v15 = vpop.xlane.xlu0 %21  ;;  %vm54_vm1 = vcmp.eq.s32.totalorder %v194_v13, %v52_v14 }
  0x7f   :  { %v24_v16 = vsub.f32 %v13_v4, %v22_v15 }
  0x81   :  { %v128_v17 = vpop.eup %127  ;;  %v27_v18 = vmul.f32 1.442695, %v24_v16  ;;  %v42_v19 = vsel %vm16_vm0, %v24_v16, 0.0  ;;  %v56_v20 = vsel %vm54_vm1, %v24_v16, 0.0 }
  0x82   :  { %43 = vadd.xlane.f32.xlu1 %v42_v19  ;;  %v29_v21 = vsel %vm16_vm0, %v128_v17, 0.0  ;;  %v60_v22 = vsel %vm16_vm0, %v56_v20, 0.0 }
  0x83   :  { %129 = vpow2.f32 %v27_v18  ;;  %30 = vadd.xlane.f32.xlu2 %v29_v21  ;;  %61 = vadd.xlane.f32.xlu0 %v60_v22 }
  0x89   :  { %v130_v23 = vpop.eup %129 }
  0x8a   :  { %v32_v24 = vsel %vm16_vm0, %v130_v23, 0.0 }
  0x8b   :  { %33 = vadd.xlane.f32.xlu2 %v32_v24 }
  0x93   :  { %58 = vadd.xlane.f32.xlu2 %v57_v26 }
  0xed   :  { %v41_v29 = vpop.xlane.xlu0 %40 }
  0xf5   :  { %v44_v41 = vpop.xlane.xlu1 %43 }
  0xf6   :  { %v31_v27 = vpop.xlane.xlu2 %30  ;;  %v62_v37 = vpop.xlane.xlu0 %61 }
  0xf7   :  { %131 = vlog2.f32 %v31_v27 }
  0xfd   :  { %v132_v28 = vpop.eup %131 }
  0xfe   :  { %v36_v30 = vmul.f32 0.6931472, %v132_v28  ;;  %v34_v31 = vpop.xlane.xlu2 %33 }
  0xff   :  { %133 = vlog2.f32 %v34_v31 }
 0x100   :  { %v63_v32 = vmul.f32 32.0, %v36_v30 }
 0x102   :  { %v65_v36 = vsub.f32 %v41_v29, %v63_v32 }
 0x104   :  { %v67_v44 = vmul.f32 -0.0032258064, %v65_v36 }
 0x105   :  { %v134_v33 = vpop.eup %133 }
 0x106   :  { %v38_v34 = vmul.f32 0.6931472, %v134_v33  ;;  %v59_v35 = vpop.xlane.xlu2 %58 }
 0x107   :  { %v69_v38 = vsub.f32 %v59_v35, %v36_v30 }
 0x108   :  { %v64_v39 = vmul.f32 32.0, %v38_v34  ;;  %v70_v40 = vsub.f32 %v62_v37, %v38_v34 }
 0x109   :  { %v71_v42 = vmul.f32 0.8967742, %v69_v38 }
 0x10a   :  { %v66_v43 = vsub.f32 %v44_v41, %v64_v39  ;;  %v72_v45 = vmul.f32 0.8967742, %v70_v40 }
 0x10b   :  { %v73_v46 = vsub.f32 %v67_v44, %v71_v42 }
 0x10c   :  { %v68_v47 = vmul.f32 -0.0032258064, %v66_v43 }
 0x10d   :  { %v87_v49 = vsel %vm86_vm3, %v73_v46, 0.0 }
 0x10e   :  { %v74_v48 = vsub.f32 %v68_v47, %v72_v45 }
 0x110   :  { %v88_v50 = vsel %vm86_vm3, %v74_v48, 0.0 }
 0x111   :  { %v89_v51 = vadd.f32 %v88_v50, %v87_v49 }
 0x113   :  { %90 = vadd.xlane.f32.xlu2 %v89_v51 }
 0x186   :  { %v91_v52 = vpop.xlane.xlu2 %90 }
 0x187   :  { %v92_v53 = vrot.slane %v91_v52, 4 }
 0x189   :  { %v93_v54 = vadd.f32 %v92_v53, %v91_v52 }
 0x18b   :  { %v94_v55 = vrot.slane %v93_v54, 2 }
 0x18d   :  { %v95_v56 = vadd.f32 %v94_v55, %v93_v54 }
 0x18f   :  { %v96_v57 = vrot.slane %v95_v56, 1 }
 0x191   :  { %v97_v58 = vadd.f32 %v96_v57, %v95_v56 }
 0x193   :  { %121 = vpush %v97_v58 }
 0x1c4   :  { %s122_s20 = spop %121 }
 0x1c5   :  { %v102_v60 = vstv %s122_s20 }
 0x1c6   :  { %v103_v61 = vsel %vm101_vm6, %v102_v60, 0.0 }
 0x1c7   :  { %104 = vst [vmem:[#allocation2] sm:$0xff] %v103_v61 }
 0x1c8   :  { %115 = dma.vmem_to_hbm [thread:$0]  %s111_s1, 128, %s113_s19, [#allocation3]  }
 0x1c9   :  { %159 = dma.done.wait [#allocation3], 128  }
 0x1ca   :  { %160 = vsyncadd [#allocation3], 4294967168 }
 0x1cb   :  { %120 = vsyncpa [#allocation3], 1 }

</bundles_post_ra>
